<compile_context>
chip_gen: v6e
topology: v6e:2x2x1
jax: 0.10.0
libtpu: 0.0.40
codegen_flags: <defaults>
</compile_context>

<pallas_src>
import jax
import jax.numpy as jnp
from jax import lax
from jax.experimental import pallas as pl
from jax.experimental.pallas import tpu as pltpu

FEAT_C = 2048          # resnet50.fc.in_features
BN_EPS = 1e-5


def encoder_head_kernel(feat_ref, w_ref, gamma_ref, beta_ref, o_ref):
    """Fused: global avg-pool (spatial sum * 1/HW) + Linear (no bias, BN-cancelled)
    + train-mode BatchNorm1d folded into a single scale/shift."""
    feats = feat_ref[...].astype(jnp.float32)                      # (N, HW, C)
    inv_hw = 1.0 / feat_ref.shape[1]                               # static constant

    # AdaptiveAvgPool2d((1,1)) as a spatial sum; scale applied post-matmul (exact).
    pooled = jnp.sum(feats, axis=1)                                # (N, C)

    # Linear(2048, OUT) on the MXU (bias omitted: cancelled by BN mean-subtraction).
    y = jnp.dot(pooled, w_ref[...].astype(jnp.float32),
                preferred_element_type=jnp.float32) * inv_hw       # (N, OUT)

    # BatchNorm1d, training-mode semantics: batch mean, biased variance,
    # folded into y * scale + shift.
    mu = jnp.mean(y, axis=0, keepdims=True)                        # (1, OUT)
    var = jnp.mean((y - mu) ** 2, axis=0, keepdims=True)           # (1, OUT)
    scale = gamma_ref[...] * lax.rsqrt(var + BN_EPS)               # (1, OUT)
    shift = beta_ref[...] - mu * scale                             # (1, OUT)
    o_ref[...] = (y * scale + shift).astype(o_ref.dtype)


def encoder_cnn_forward(feat_nhwc, w_t, gamma, beta):
    """feat_nhwc: (N, H, W, C) channels-last backbone feature map (resnet layer4 out).
    w_t: (C, OUT) = lastLayer.weight.T ; gamma/beta: (1, OUT) BatchNorm1d affine."""
    N, H, W, C = feat_nhwc.shape
    out = w_t.shape[1]
    # Train-mode BatchNorm1d needs batch > 1 (PyTorch raises for N == 1).
    assert N >= 2, "EncoderCNN train-mode BatchNorm1d requires batch size >= 2"

    # Contiguous reshape only (adjacent dims merged): no transpose, no HBM round trip.
    feats = feat_nhwc.reshape(N, H * W, C)                         # (N, HW, C)

    return pl.pallas_call(
        encoder_head_kernel,
        out_shape=jax.ShapeDtypeStruct((N, out), jnp.float32),
        grid=(1,),                                                 # single step: everything fits VMEM
        in_specs=[
            pl.BlockSpec((N, H * W, C), lambda k: (0, 0, 0)),
            pl.BlockSpec((C, out),      lambda k: (0, 0)),
            pl.BlockSpec((1, out),      lambda k: (0, 0)),
            pl.BlockSpec((1, out),      lambda k: (0, 0)),
        ],
        out_specs=pl.BlockSpec((N, out), lambda k: (0, 0)),
        compiler_params=pltpu.CompilerParams(
            dimension_semantics=("arbitrary",)),
    )(feats, w_t, gamma, beta)


def _reference(feat_nhwc, w_t, b, gamma, beta):
    """Pure-JAX reference matching the PyTorch forward (Linear *with* bias)."""
    pooled = jnp.mean(feat_nhwc.astype(jnp.float32), axis=(1, 2))  # (N, C)
    y = pooled @ w_t.astype(jnp.float32) + b
    mu = jnp.mean(y, axis=0, keepdims=True)
    var = jnp.mean((y - mu) ** 2, axis=0, keepdims=True)
    return (y - mu) * lax.rsqrt(var + BN_EPS) * gamma + beta


if __name__ == "__main__":
    output_size = 32
    N, H, W = 2, 4, 4          # feature map of resnet layer4 for a small image

    key = jax.random.PRNGKey(0)
    k_feat, k_w, k_b = jax.random.split(key, 3)

    # Stand-in for resNetToUse(...) up to (but not including) the avg-pool,
    # emitted channels-last so no wrapper transpose is needed.
    # TODO(synk): produced synthetically instead of the frozen ResNet-50 body.
    feats = jax.random.normal(k_feat, (N, H, W, FEAT_C), dtype=jnp.float32)

    # nn.Linear(2048, output_size) default init: U(-1/sqrt(in), 1/sqrt(in)).
    bound = 1.0 / jnp.sqrt(jnp.float32(FEAT_C))
    w = jax.random.uniform(k_w, (output_size, FEAT_C), jnp.float32, -bound, bound)
    b = jax.random.uniform(k_b, (output_size,), jnp.float32, -bound, bound)
    w_t = jnp.asarray(w.T)                                          # (C, OUT)

    # nn.BatchNorm1d(output_size) default init: gamma=1, beta=0.
    gamma = jnp.ones((1, output_size), jnp.float32)
    beta = jnp.zeros((1, output_size), jnp.float32)

    out = encoder_cnn_forward(feats, w_t, gamma, beta)
    out = jax.block_until_ready(out)

    # Reference keeps the Linear bias; train-mode BN cancels it exactly.
    ref = _reference(feats, w_t, b.reshape(1, output_size), gamma, beta)
    assert out.shape == (N, output_size)
    assert jnp.allclose(out, ref, atol=1e-4, rtol=1e-4)

    print("KERNEL_OK")
</pallas_src>

<mosaic_0001>
module attributes {stable_mosaic.version = 11 : i64} {
  func.func @encoder_head_kernel(%arg0: i32, %arg1: memref<2x16x2048xf32, #tpu.memory_space<vmem>>, %arg2: memref<2048x32xf32, #tpu.memory_space<vmem>>, %arg3: memref<1x32xf32, #tpu.memory_space<vmem>>, %arg4: memref<1x32xf32, #tpu.memory_space<vmem>>, %arg5: memref<2x32xf32, #tpu.memory_space<vmem>>) attributes {dimension_semantics = [#tpu.dimension_semantics<arbitrary>], iteration_bounds = array<i64: 1>, scalar_prefetch = 0 : i64, scratch_operands = 0 : i64, tpu.core_type = #tpu.core_type<tc>, window_params = [{pipeline_mode = #tpu.pipeline_mode<synchronous>, transform_indices = @transform_0, window_bounds = array<i64: 2, 16, 2048>}, {pipeline_mode = #tpu.pipeline_mode<synchronous>, transform_indices = @transform_1, window_bounds = array<i64: 2048, 32>}, {pipeline_mode = #tpu.pipeline_mode<synchronous>, transform_indices = @transform_2, window_bounds = array<i64: 1, 32>}, {pipeline_mode = #tpu.pipeline_mode<synchronous>, transform_indices = @transform_3, window_bounds = array<i64: 1, 32>}, {pipeline_mode = #tpu.pipeline_mode<synchronous>, transform_indices = @transform_4, window_bounds = array<i64: 2, 32>}]} {
    %c0 = arith.constant 0 : index
    %c0_0 = arith.constant 0 : index
    %c0_1 = arith.constant 0 : index
    %0 = vector.load %arg1[%c0, %c0_0, %c0_1] : memref<2x16x2048xf32, #tpu.memory_space<vmem>>, vector<2x16x2048xf32>
    %cst = arith.constant dense<0.000000e+00> : vector<2x2048xf32>
    %1 = vector.multi_reduction <add>, %0, %cst [1] : vector<2x16x2048xf32> to vector<2x2048xf32>
    %c0_2 = arith.constant 0 : index
    %c0_3 = arith.constant 0 : index
    %2 = vector.load %arg2[%c0_2, %c0_3] : memref<2048x32xf32, #tpu.memory_space<vmem>>, vector<2048x32xf32>
    %cst_4 = arith.constant dense<0.000000e+00> : vector<2x32xf32>
    %3 = tpu.matmul %1, %2, %cst_4 {dimension_numbers = #tpu.dot_dimension_numbers<[1], [0], [0], [1], [0, 0, 1, 1], [], []>} : vector<2x2048xf32>, vector<2048x32xf32>, vector<2x32xf32> -> vector<2x32xf32>
    %cst_5 = arith.constant 6.250000e-02 : f32
    %4 = vector.broadcast %cst_5 : f32 to vector<2x32xf32>
    %5 = arith.mulf %3, %4 : vector<2x32xf32>
    %cst_6 = arith.constant dense<0.000000e+00> : vector<32xf32>
    %6 = vector.multi_reduction <add>, %5, %cst_6 [0] : vector<2x32xf32> to vector<32xf32>
    %7 = vector.shape_cast %6 : vector<32xf32> to vector<1x32xf32>
    %cst_7 = arith.constant 2.000000e+00 : f32
    %8 = vector.broadcast %cst_7 : f32 to vector<1x32xf32>
    %9 = arith.divf %7, %8 : vector<1x32xf32>
    %10 = vector.broadcast %9 : vector<1x32xf32> to vector<2x32xf32>
    %11 = arith.subf %5, %10 : vector<2x32xf32>
    %12 = arith.mulf %11, %11 : vector<2x32xf32>
    %cst_8 = arith.constant dense<0.000000e+00> : vector<32xf32>
    %13 = vector.multi_reduction <add>, %12, %cst_8 [0] : vector<2x32xf32> to vector<32xf32>
    %14 = vector.shape_cast %13 : vector<32xf32> to vector<1x32xf32>
    %cst_9 = arith.constant 2.000000e+00 : f32
    %15 = vector.broadcast %cst_9 : f32 to vector<1x32xf32>
    %16 = arith.divf %14, %15 : vector<1x32xf32>
    %c0_10 = arith.constant 0 : index
    %c0_11 = arith.constant 0 : index
    %17 = vector.load %arg3[%c0_10, %c0_11] : memref<1x32xf32, #tpu.memory_space<vmem>>, vector<1x32xf32>
    %cst_12 = arith.constant 9.99999974E-6 : f32
    %18 = vector.broadcast %cst_12 : f32 to vector<1x32xf32>
    %19 = arith.addf %16, %18 : vector<1x32xf32>
    %20 = math.rsqrt %19 : vector<1x32xf32>
    %21 = arith.mulf %17, %20 : vector<1x32xf32>
    %c0_13 = arith.constant 0 : index
    %c0_14 = arith.constant 0 : index
    %22 = vector.load %arg4[%c0_13, %c0_14] : memref<1x32xf32, #tpu.memory_space<vmem>>, vector<1x32xf32>
    %23 = arith.mulf %9, %21 : vector<1x32xf32>
    %24 = arith.subf %22, %23 : vector<1x32xf32>
    %25 = vector.broadcast %21 : vector<1x32xf32> to vector<2x32xf32>
    %26 = arith.mulf %5, %25 : vector<2x32xf32>
    %27 = vector.broadcast %24 : vector<1x32xf32> to vector<2x32xf32>
    %28 = arith.addf %26, %27 : vector<2x32xf32>
    %c0_15 = arith.constant 0 : index
    %c0_16 = arith.constant 0 : index
    %29 = vector.load %arg5[%c0_15, %c0_16] : memref<2x32xf32, #tpu.memory_space<vmem>>, vector<2x32xf32>
    tpu.vector_store %arg5[%c0_15, %c0_16], %28 {strides = array<i32>} : memref<2x32xf32, #tpu.memory_space<vmem>>, vector<2x32xf32>,
    return
  }
  func.func @transform_0(%arg0: i32) -> (i32, i32, i32) {
    %c0_i32 = arith.constant 0 : i32
    %c0_i32_0 = arith.constant 0 : i32
    %c0_i32_1 = arith.constant 0 : i32
    %c0_i32_2 = arith.constant 0 : i32
    return %c0_i32, %c0_i32_0, %c0_i32_1 : i32, i32, i32
  }
  func.func @transform_1(%arg0: i32) -> (i32, i32) {
    %c0_i32 = arith.constant 0 : i32
    %c0_i32_0 = arith.constant 0 : i32
    %c0_i32_1 = arith.constant 0 : i32
    return %c0_i32, %c0_i32_0 : i32, i32
  }
  func.func @transform_2(%arg0: i32) -> (i32, i32) {
    %c0_i32 = arith.constant 0 : i32
    %c0_i32_0 = arith.constant 0 : i32
    %c0_i32_1 = arith.constant 0 : i32
    return %c0_i32, %c0_i32_0 : i32, i32
  }
  func.func @transform_3(%arg0: i32) -> (i32, i32) {
    %c0_i32 = arith.constant 0 : i32
    %c0_i32_0 = arith.constant 0 : i32
    %c0_i32_1 = arith.constant 0 : i32
    return %c0_i32, %c0_i32_0 : i32, i32
  }
  func.func @transform_4(%arg0: i32) -> (i32, i32) {
    %c0_i32 = arith.constant 0 : i32
    %c0_i32_0 = arith.constant 0 : i32
    %c0_i32_1 = arith.constant 0 : i32
    return %c0_i32, %c0_i32_0 : i32, i32
  }
}

</mosaic_0001>

<bundles_post_ra>
// kernel: tpu_custom_call.1
= control target key start
LH: loop header
LB: loop body
LE: loop exit
PB: predicated region body
PF: predicated region fallthrough
CT: control target
= control target key end

     0   :  { %vm594_vm0 = vcmask 1041409   ;;  %s2563_s0 = inlined_call_operand.vmem [shape: f32[2,16,2048], index: 0, kind: input, shape index: {}]   ;;  %s2564_s1 = inlined_call_operand.vmem [shape: f32[2048,32], index: 1, kind: input, shape index: {}]   ;;  %s2565_s2 = inlined_call_operand.vmem [shape: f32[1,32], index: 2, kind: input, shape index: {}]   ;;  %s2566_s3 = inlined_call_operand.vmem [shape: f32[1,32], index: 3, kind: input, shape index: {}]   ;;  %s2567_s4 = inlined_call_operand.hbm [shape: f32[2,32], index: 4, kind: output, shape index: {}]  }
   0x1   :  { %v337_v0 = vld [vmem:[%s2564_s1 + $0xf8] sm:$0xff]  ;;  %v336_v4 = vld [vmem:[%s2564_s1 + $0xf0] sm:$0xff]  ;;  %v335_v8 = vld [vmem:[%s2564_s1 + $0xe8] sm:$0xff] }
   0x2   :  { %v369_v1 = vld [vmem:[%s2564_s1 + $0x1f8] sm:$0xff]  ;;  %1244 = vmatprep.subr.mxu0 %v337_v0  ;;  %v368_v5 = vld [vmem:[%s2564_s1 + $0x1f0] sm:$0xff]  ;;  %v367_v9 = vld [vmem:[%s2564_s1 + $0x1e8] sm:$0xff] }
   0x3   :  { %v321_v2 = vld [vmem:[%s2564_s1 + $0x78] sm:$0xff]  ;;  %1279 = vmatprep.subr.mxu1 %v369_v1  ;;  %v320_v6 = vld [vmem:[%s2564_s1 + $0x70] sm:$0xff]  ;;  %v319_v10 = vld [vmem:[%s2564_s1 + $0x68] sm:$0xff] }
   0x4   :  { %v353_v3 = vld [vmem:[%s2564_s1 + $0x178] sm:$0xff]  ;;  %1245 = vmatpush3.msra.mxu0 %v321_v2  ;;  %v352_v7 = vld [vmem:[%s2564_s1 + $0x170] sm:$0xff]  ;;  %v351_v11 = vld [vmem:[%s2564_s1 + $0x168] sm:$0xff] }
   0x5   :  { %1280 = vmatpush3.msra.mxu1 %v353_v3  ;;  %1246 = vmatprep.subr.mxu0 %v336_v4  ;;  %v334_v12 = vld [vmem:[%s2564_s1 + $0xe0] sm:$0xff]  ;;  %v333_v16 = vld [vmem:[%s2564_s1 + $0xd8] sm:$0xff]  ;;  %v332_v20 = vld [vmem:[%s2564_s1 + $0xd0] sm:$0xff] }
   0x6   :  { %1281 = vmatprep.subr.mxu1 %v368_v5  ;;  %1247 = vmatpush3.msra.mxu0 %v320_v6  ;;  %v366_v13 = vld [vmem:[%s2564_s1 + $0x1e0] sm:$0xff]  ;;  %v365_v17 = vld [vmem:[%s2564_s1 + $0x1d8] sm:$0xff]  ;;  %v364_v21 = vld [vmem:[%s2564_s1 + $0x1d0] sm:$0xff] }
   0x7   :  { %1282 = vmatpush3.msra.mxu1 %v352_v7  ;;  %1248 = vmatprep.subr.mxu0 %v335_v8  ;;  %v318_v14 = vld [vmem:[%s2564_s1 + $0x60] sm:$0xff]  ;;  %v317_v18 = vld [vmem:[%s2564_s1 + $0x58] sm:$0xff]  ;;  %v316_v22 = vld [vmem:[%s2564_s1 + $0x50] sm:$0xff] }
   0x8   :  { %1283 = vmatprep.subr.mxu1 %v367_v9  ;;  %v350_v15 = vld [vmem:[%s2564_s1 + $0x160] sm:$0xff]  ;;  %1249 = vmatpush3.msra.mxu0 %v319_v10  ;;  %v349_v19 = vld [vmem:[%s2564_s1 + $0x158] sm:$0xff]  ;;  %v348_v23 = vld [vmem:[%s2564_s1 + $0x150] sm:$0xff] }
   0x9   :  { %1284 = vmatpush3.msra.mxu1 %v351_v11  ;;  %1250 = vmatprep.subr.mxu0 %v334_v12  ;;  %v331_v24 = vld [vmem:[%s2564_s1 + $0xc8] sm:$0xff]  ;;  %v330_v28 = vld [vmem:[%s2564_s1 + $0xc0] sm:$0xff]  ;;  %v329_v32 = vld [vmem:[%s2564_s1 + $0xb8] sm:$0xff] }
   0xa   :  { %1285 = vmatprep.subr.mxu1 %v366_v13  ;;  %1251 = vmatpush3.msra.mxu0 %v318_v14  ;;  %v363_v25 = vld [vmem:[%s2564_s1 + $0x1c8] sm:$0xff]  ;;  %v362_v29 = vld [vmem:[%s2564_s1 + $0x1c0] sm:$0xff]  ;;  %v361_v33 = vld [vmem:[%s2564_s1 + $0x1b8] sm:$0xff] }
   0xb   :  { %1286 = vmatpush3.msra.mxu1 %v350_v15  ;;  %1252 = vmatprep.subr.mxu0 %v333_v16  ;;  %v315_v26 = vld [vmem:[%s2564_s1 + $0x48] sm:$0xff]  ;;  %v314_v30 = vld [vmem:[%s2564_s1 + $0x40] sm:$0xff]  ;;  %v313_v34 = vld [vmem:[%s2564_s1 + $0x38] sm:$0xff] }
   0xc   :  { %1287 = vmatprep.subr.mxu1 %v365_v17  ;;  %1253 = vmatpush3.msra.mxu0 %v317_v18  ;;  %v347_v27 = vld [vmem:[%s2564_s1 + $0x148] sm:$0xff]  ;;  %v346_v31 = vld [vmem:[%s2564_s1 + $0x140] sm:$0xff]  ;;  %v345_v35 = vld [vmem:[%s2564_s1 + $0x138] sm:$0xff] }
   0xd   :  { %1288 = vmatpush3.msra.mxu1 %v349_v19  ;;  %1254 = vmatprep.subr.mxu0 %v332_v20  ;;  %v328_v36 = vld [vmem:[%s2564_s1 + $0xb0] sm:$0xff]  ;;  %v327_v40 = vld [vmem:[%s2564_s1 + $0xa8] sm:$0xff]  ;;  %v326_v44 = vld [vmem:[%s2564_s1 + $0xa0] sm:$0xff] }
   0xe   :  { %1289 = vmatprep.subr.mxu1 %v364_v21  ;;  %1255 = vmatpush3.msra.mxu0 %v316_v22  ;;  %v360_v37 = vld [vmem:[%s2564_s1 + $0x1b0] sm:$0xff]  ;;  %v359_v41 = vld [vmem:[%s2564_s1 + $0x1a8] sm:$0xff]  ;;  %v358_v45 = vld [vmem:[%s2564_s1 + $0x1a0] sm:$0xff] }
   0xf   :  { %1290 = vmatpush3.msra.mxu1 %v348_v23  ;;  %1256 = vmatprep.subr.mxu0 %v331_v24  ;;  %v312_v38 = vld [vmem:[%s2564_s1 + $0x30] sm:$0xff]  ;;  %v311_v42 = vld [vmem:[%s2564_s1 + $0x28] sm:$0xff]  ;;  %v310_v46 = vld [vmem:[%s2564_s1 + $0x20] sm:$0xff] }
  0x10   :  { %1291 = vmatprep.subr.mxu1 %v363_v25  ;;  %1257 = vmatpush3.msra.mxu0 %v315_v26  ;;  %v344_v39 = vld [vmem:[%s2564_s1 + $0x130] sm:$0xff]  ;;  %v343_v43 = vld [vmem:[%s2564_s1 + $0x128] sm:$0xff]  ;;  %v342_v47 = vld [vmem:[%s2564_s1 + $0x120] sm:$0xff] }
  0x11   :  { %1292 = vmatpush3.msra.mxu1 %v347_v27  ;;  %1258 = vmatprep.subr.mxu0 %v330_v28  ;;  %v325_v48 = vld [vmem:[%s2564_s1 + $0x98] sm:$0xff]  ;;  %v19_v52 = vld [vmem:[%s2563_s0 + $0x8] sm:$0xff]  ;;  %v324_v55 = vld [vmem:[%s2564_s1 + $0x90] sm:$0xff] }
  0x12   :  { %1293 = vmatprep.subr.mxu1 %v362_v29  ;;  %1259 = vmatpush3.msra.mxu0 %v314_v30  ;;  %v357_v49 = vld [vmem:[%s2564_s1 + $0x198] sm:$0xff]  ;;  %v35_v53 = vld [vmem:[%s2563_s0 + $0x88] sm:$0xff]  ;;  %v356_v56 = vld [vmem:[%s2564_s1 + $0x190] sm:$0xff] }
  0x13   :  { %1294 = vmatpush3.msra.mxu1 %v346_v31  ;;  %1260 = vmatprep.subr.mxu0 %v329_v32  ;;  %v309_v50 = vld [vmem:[%s2564_s1 + $0x18] sm:$0xff]  ;;  %v51_v54 = vld [vmem:[%s2563_s0 + $0x108] sm:$0xff]  ;;  %v89_v58 = vadd.f32 %v35_v53, %v19_v52  ;;  %v308_v60 = vld [vmem:[%s2564_s1 + $0x10] sm:$0xff] }
  0x14   :  { %1295 = vmatprep.subr.mxu1 %v361_v33  ;;  %1261 = vmatpush3.msra.mxu0 %v313_v34  ;;  %v341_v51 = vld [vmem:[%s2564_s1 + $0x118] sm:$0xff]  ;;  %v67_v57 = vld [vmem:[%s2563_s0 + $0x188] sm:$0xff]  ;;  %v340_v61 = vld [vmem:[%s2564_s1 + $0x110] sm:$0xff] }
  0x15   :  { %1296 = vmatpush3.msra.mxu1 %v345_v35  ;;  %1262 = vmatprep.subr.mxu0 %v328_v36  ;;  %v21_v59 = vld [vmem:[%s2563_s0 + $0x18] sm:$0xff]  ;;  %v201_v62 = vadd.f32 %v67_v57, %v51_v54  ;;  %v323_v2 = vld [vmem:[%s2564_s1 + $0x88] sm:$0xff]  ;;  %v90_v3 = vrot.slane %v89_v58, 4  ;;  %v18_v6 = vld [vmem:[%s2563_s0] sm:$0xff] }
  0x16   :  { %1297 = vmatprep.subr.mxu1 %v360_v37  ;;  %1263 = vmatpush3.msra.mxu0 %v312_v38  ;;  %v37_v63 = vld [vmem:[%s2563_s0 + $0x98] sm:$0xff]  ;;  %v34_v7 = vld [vmem:[%s2563_s0 + $0x80] sm:$0xff]  ;;  %v20_v12 = vld [vmem:[%s2563_s0 + $0x10] sm:$0xff] }
  0x17   :  { %1298 = vmatpush3.msra.mxu1 %v344_v39  ;;  %1264 = vmatprep.subr.mxu0 %v327_v40  ;;  %v53_v0 = vld [vmem:[%s2563_s0 + $0x118] sm:$0xff]  ;;  %v103_v4 = vadd.f32 %v37_v63, %v21_v59  ;;  %v50_v8 = vld [vmem:[%s2563_s0 + $0x100] sm:$0xff]  ;;  %v202_v9 = vrot.slane %v201_v62, 4  ;;  %v82_v11 = vadd.f32 %v34_v7, %v18_v6  ;;  %v36_v13 = vld [vmem:[%s2563_s0 + $0x90] sm:$0xff]  ;;  %v91_v15 = vadd.f32 %v90_v3, %v89_v58 }
  0x18   :  { %1299 = vmatprep.subr.mxu1 %v359_v41  ;;  %1265 = vmatpush3.msra.mxu0 %v311_v42  ;;  %v69_v1 = vld [vmem:[%s2563_s0 + $0x198] sm:$0xff]  ;;  %v66_v10 = vld [vmem:[%s2563_s0 + $0x180] sm:$0xff]  ;;  %v355_v14 = vld [vmem:[%s2564_s1 + $0x188] sm:$0xff]  ;;  %v96_v25 = vadd.f32 %v36_v13, %v20_v12 }
  0x19   :  { %1300 = vmatpush3.msra.mxu1 %v343_v43  ;;  %1266 = vmatprep.subr.mxu0 %v326_v44  ;;  %v215_v5 = vadd.f32 %v69_v1, %v53_v0  ;;  %v104_v16 = vrot.slane %v103_v4, 4  ;;  %v194_v18 = vadd.f32 %v66_v10, %v50_v8  ;;  %v52_v19 = vld [vmem:[%s2563_s0 + $0x110] sm:$0xff]  ;;  %v307_v21 = vld [vmem:[%s2564_s1 + $0x8] sm:$0xff]  ;;  %v203_v23 = vadd.f32 %v202_v9, %v201_v62  ;;  %v322_v27 = vld [vmem:[%s2564_s1 + $0x80] sm:$0xff] }
  0x1a   :  { %1301 = vmatprep.subr.mxu1 %v358_v45  ;;  %1267 = vmatpush3.msra.mxu0 %v310_v46  ;;  %v68_v20 = vld [vmem:[%s2563_s0 + $0x190] sm:$0xff]  ;;  %v339_v22 = vld [vmem:[%s2564_s1 + $0x108] sm:$0xff]  ;;  %v83_v24 = vrot.slane %v82_v11, 4  ;;  %v354_v28 = vld [vmem:[%s2564_s1 + $0x180] sm:$0xff]  ;;  %v92_v29 = vrot.slane %v91_v15, 2  ;;  %v97_v37 = vrot.slane %v96_v25, 4 }
  0x1b   :  { %1302 = vmatpush3.msra.mxu1 %v342_v47  ;;  %1268 = vmatprep.subr.mxu0 %v325_v48  ;;  %v216_v17 = vrot.slane %v215_v5, 4  ;;  %v208_v26 = vadd.f32 %v68_v20, %v52_v19  ;;  %v105_v30 = vadd.f32 %v104_v16, %v103_v4  ;;  %v195_v32 = vrot.slane %v194_v18, 4  ;;  %v306_v33 = vld [vmem:[%s2564_s1] sm:$0xff]  ;;  %v401_v43 = vld [vmem:[%s2564_s1 + $0x2f8] sm:$0xff]  ;;  %v416_v19 = vld [vmem:[%s2564_s1 + $0x370] sm:$0xff] }
  0x1c   :  { %1303 = vmatprep.subr.mxu1 %v357_v49  ;;  %1269 = vmatpush3.msra.mxu0 %v309_v50  ;;  %v204_v34 = vrot.slane %v203_v23, 2  ;;  %v338_v35 = vld [vmem:[%s2564_s1 + $0x100] sm:$0xff]  ;;  %v84_v36 = vadd.f32 %v83_v24, %v82_v11  ;;  %v93_v39 = vadd.f32 %v92_v29, %v91_v15  ;;  %v433_v44 = vld [vmem:[%s2564_s1 + $0x3f8] sm:$0xff]  ;;  %v98_v47 = vadd.f32 %v97_v37, %v96_v25  ;;  %v400_v15 = vld [vmem:[%s2564_s1 + $0x2f0] sm:$0xff] }
  0x1d   :  { %1304 = vmatpush3.msra.mxu1 %v341_v51  ;;  %1270 = vmatprep.subr.mxu0 %v324_v55  ;;  %v217_v31 = vadd.f32 %v216_v17, %v215_v5  ;;  %v209_v38 = vrot.slane %v208_v26, 4  ;;  %v106_v40 = vrot.slane %v105_v30, 2  ;;  %v196_v42 = vadd.f32 %v195_v32, %v194_v18  ;;  %v385_v12 = vld [vmem:[%s2564_s1 + $0x278] sm:$0xff]  ;;  %v432_v17 = vld [vmem:[%s2564_s1 + $0x3f0] sm:$0xff]  ;;  %v399_v20 = vld [vmem:[%s2564_s1 + $0x2e8] sm:$0xff] }
  0x1e   :  { %1305 = vmatprep.subr.mxu1 %v356_v56  ;;  %1271 = vmatpush3.msra.mxu0 %v308_v60  ;;  %v205_v45 = vadd.f32 %v204_v34, %v203_v23  ;;  %v85_v46 = vrot.slane %v84_v36, 2  ;;  %v94_v49 = vrot.slane %v93_v39, 1  ;;  %v99_v55 = vrot.slane %v98_v47, 2  ;;  %v384_v18 = vld [vmem:[%s2564_s1 + $0x270] sm:$0xff]  ;;  %v415_v23 = vld [vmem:[%s2564_s1 + $0x368] sm:$0xff]  ;;  %v398_v24 = vld [vmem:[%s2564_s1 + $0x2e0] sm:$0xff] }
  0x1f   :  { %1306 = vmatpush3.msra.mxu1 %v340_v61  ;;  %1272 = vmatprep.subr.mxu0 %v323_v2  ;;  %v218_v41 = vrot.slane %v217_v31, 2  ;;  %v210_v48 = vadd.f32 %v209_v38, %v208_v26  ;;  %v107_v50 = vadd.f32 %v106_v40, %v105_v30  ;;  %v197_v52 = vrot.slane %v196_v42, 2  ;;  %v430_v25 = vld [vmem:[%s2564_s1 + $0x3e0] sm:$0xff]  ;;  %v429_v29 = vld [vmem:[%s2564_s1 + $0x3d8] sm:$0xff]  ;;  %v396_v32 = vld [vmem:[%s2564_s1 + $0x2d0] sm:$0xff] }
  0x20   :  { %1307 = vmatprep.subr.mxu1 %v355_v14  ;;  %1273 = vmatpush3.msra.mxu0 %v307_v21  ;;  %v206_v53 = vrot.slane %v205_v45, 1  ;;  %v86_v54 = vadd.f32 %v85_v46, %v84_v36  ;;  %v95_v57 = vadd.f32 %v94_v49, %v93_v39  ;;  %v100_v63 = vadd.f32 %v99_v55, %v98_v47  ;;  %v417_v14 = vld [vmem:[%s2564_s1 + $0x378] sm:$0xff]  ;;  %v431_v21 = vld [vmem:[%s2564_s1 + $0x3e8] sm:$0xff]  ;;  %v382_v26 = vld [vmem:[%s2564_s1 + $0x260] sm:$0xff] }
  0x21   :  { %1308 = vmatpush3.msra.mxu1 %v339_v22  ;;  %1274 = vmatprep.subr.mxu0 %v322_v27  ;;  %v219_v51 = vadd.f32 %v218_v41, %v217_v31  ;;  %v211_v56 = vrot.slane %v210_v48, 2  ;;  %v108_v58 = vrot.slane %v107_v50, 1  ;;  %v198_v60 = vadd.f32 %v197_v52, %v196_v42  ;;  %v383_v22 = vld [vmem:[%s2564_s1 + $0x268] sm:$0xff]  ;;  %v414_v27 = vld [vmem:[%s2564_s1 + $0x360] sm:$0xff]  ;;  %v381_v30 = vld [vmem:[%s2564_s1 + $0x258] sm:$0xff] }
  0x22   :  { %1309 = vmatprep.subr.mxu1 %v354_v28  ;;  %1275 = vmatpush3.msra.mxu0 %v306_v33  ;;  %v207_v61 = vadd.f32 %v206_v53, %v205_v45  ;;  %v87_v62 = vrot.slane %v86_v54, 1  ;;  %v101_v6 = vrot.slane %v100_v63, 1  ;;  %v397_v28 = vld [vmem:[%s2564_s1 + $0x2d8] sm:$0xff]  ;;  %v428_v33 = vld [vmem:[%s2564_s1 + $0x3d0] sm:$0xff]  ;;  %v395_v37 = vld [vmem:[%s2564_s1 + $0x2c8] sm:$0xff] }
  0x23   :  { %1310 = vmatpush3.msra.mxu1 %v338_v35  ;;  %1314 = vmatprep.subr.mxu0 %v401_v43  ;;  %v220_v59 = vrot.slane %v219_v51, 1  ;;  %v212_v0 = vadd.f32 %v211_v56, %v210_v48  ;;  %v109_v1 = vadd.f32 %v108_v58, %v107_v50  ;;  %v199_v3 = vrot.slane %v198_v60, 1  ;;  %v413_v31 = vld [vmem:[%s2564_s1 + $0x358] sm:$0xff]  ;;  %v380_v34 = vld [vmem:[%s2564_s1 + $0x250] sm:$0xff]  ;;  %v23_v35 = vld [vmem:[%s2563_s0 + $0x28] sm:$0xff] }
  0x24   :  { %1349 = vmatprep.subr.mxu1 %v433_v44  ;;  %v596_v4 = vsel %vm594_vm0, %v207_v61, %v95_v57  ;;  %v88_v5 = vadd.f32 %v87_v62, %v86_v54  ;;  %v102_v10 = vadd.f32 %v101_v6, %v100_v63  ;;  %v412_v36 = vld [vmem:[%s2564_s1 + $0x350] sm:$0xff]  ;;  %v39_v38 = vld [vmem:[%s2563_s0 + $0xa8] sm:$0xff]  ;;  %v22_v45 = vld [vmem:[%s2563_s0 + $0x20] sm:$0xff] }
  0x25   :  { %v221_v2 = vadd.f32 %v220_v59, %v219_v51  ;;  %v213_v7 = vrot.slane %v212_v0, 1  ;;  %691 = vmatprep.mubr.f32.mxu0 %v596_v4  ;;  %v200_v9 = vadd.f32 %v199_v3, %v198_v60  ;;  %v55_v39 = vld [vmem:[%s2563_s0 + $0x128] sm:$0xff]  ;;  %v117_v43 = vadd.f32 %v39_v38, %v23_v35  ;;  %v38_v46 = vld [vmem:[%s2563_s0 + $0xa0] sm:$0xff]  ;;  %v25_v52 = vld [vmem:[%s2563_s0 + $0x38] sm:$0xff] }
  0x26   :  { %v71_v40 = vld [vmem:[%s2563_s0 + $0x1a8] sm:$0xff]  ;;  %v394_v48 = vld [vmem:[%s2564_s1 + $0x2c0] sm:$0xff]  ;;  %v110_v51 = vadd.f32 %v38_v46, %v22_v45  ;;  %v41_v56 = vld [vmem:[%s2563_s0 + $0xb8] sm:$0xff] }
  0x27   :  { %v598_v8 = vsel %vm594_vm0, %v221_v2, %v109_v1  ;;  %v214_v11 = vadd.f32 %v213_v7, %v212_v0  ;;  %v595_v13 = vsel %vm594_vm0, %v200_v9, %v88_v5  ;;  %v427_v41 = vld [vmem:[%s2564_s1 + $0x3c8] sm:$0xff]  ;;  %v229_v44 = vadd.f32 %v71_v40, %v55_v39  ;;  %v54_v49 = vld [vmem:[%s2563_s0 + $0x120] sm:$0xff]  ;;  %v57_v57 = vld [vmem:[%s2563_s0 + $0x138] sm:$0xff] }
  0x28   :  { %761 = vmatprep.mubr.f32.mxu1 %v598_v8  ;;  %692 = vmatmul.mubr.f32.vlgmr.msra.gmra.mxu0 %v595_v13  ;;  %v379_v42 = vld [vmem:[%s2564_s1 + $0x248] sm:$0xff]  ;;  %v70_v50 = vld [vmem:[%s2563_s0 + $0x1a0] sm:$0xff]  ;;  %v118_v53 = vrot.slane %v117_v43, 4  ;;  %v73_v58 = vld [vmem:[%s2563_s0 + $0x1b8] sm:$0xff]  ;;  %v111_v61 = vrot.slane %v110_v51, 4  ;;  %v131_v62 = vadd.f32 %v41_v56, %v25_v52 }
  0x29   :  { %v597_v16 = vsel %vm594_vm0, %v214_v11, %v102_v10  ;;  %1315 = vmatpush3.msra.mxu0 %v385_v12  ;;  %v411_v47 = vld [vmem:[%s2564_s1 + $0x348] sm:$0xff]  ;;  %v230_v54 = vrot.slane %v229_v44, 4  ;;  %v222_v55 = vadd.f32 %v70_v50, %v54_v49  ;;  %v426_v59 = vld [vmem:[%s2564_s1 + $0x3c0] sm:$0xff]  ;;  %v243_v63 = vadd.f32 %v73_v58, %v57_v57  ;;  %v24_v0 = vld [vmem:[%s2563_s0 + $0x30] sm:$0xff] }
  0x2a   :  { %762 = vmatmul.mubr.f32.vlgmr.msra.gmra.mxu1 %v597_v16  ;;  %1316 = vmatprep.subr.mxu0 %v400_v15  ;;  %v378_v60 = vld [vmem:[%s2564_s1 + $0x240] sm:$0xff]  ;;  %v119_v1 = vadd.f32 %v118_v53, %v117_v43  ;;  %v40_v4 = vld [vmem:[%s2563_s0 + $0xb0] sm:$0xff]  ;;  %v393_v8 = vld [vmem:[%s2564_s1 + $0x2b8] sm:$0xff]  ;;  %v112_v9 = vadd.f32 %v111_v61, %v110_v51  ;;  %v132_v10 = vrot.slane %v131_v62, 4 }
  0x2b   :  { %1350 = vmatpush3.msra.mxu1 %v417_v14  ;;  %1317 = vmatpush3.msra.mxu0 %v384_v18  ;;  %v231_v2 = vadd.f32 %v230_v54, %v229_v44  ;;  %v223_v3 = vrot.slane %v222_v55, 4  ;;  %v56_v5 = vld [vmem:[%s2563_s0 + $0x130] sm:$0xff]  ;;  %v410_v7 = vld [vmem:[%s2564_s1 + $0x340] sm:$0xff]  ;;  %v244_v11 = vrot.slane %v243_v63, 4  ;;  %v124_v12 = vadd.f32 %v40_v4, %v24_v0  ;;  %v425_v13 = vld [vmem:[%s2564_s1 + $0x3b8] sm:$0xff] }
  0x2c   :  { %1351 = vmatprep.subr.mxu1 %v432_v17  ;;  %1318 = vmatprep.subr.mxu0 %v399_v20  ;;  %v72_v6 = vld [vmem:[%s2563_s0 + $0x1b0] sm:$0xff]  ;;  %v377_v14 = vld [vmem:[%s2564_s1 + $0x238] sm:$0xff]  ;;  %v120_v15 = vrot.slane %v119_v1, 2  ;;  %v375_v38 = vld [vmem:[%s2564_s1 + $0x228] sm:$0xff] }
  0x2d   :  { %1352 = vmatpush3.msra.mxu1 %v416_v19  ;;  %1319 = vmatpush3.msra.mxu0 %v383_v22  ;;  %v232_v16 = vrot.slane %v231_v2, 2  ;;  %v224_v17 = vadd.f32 %v223_v3, %v222_v55  ;;  %v236_v18 = vadd.f32 %v72_v6, %v56_v5  ;;  %v409_v19 = vld [vmem:[%s2564_s1 + $0x338] sm:$0xff]  ;;  %v392_v20 = vld [vmem:[%s2564_s1 + $0x2b0] sm:$0xff]  ;;  %v133_v22 = vadd.f32 %v132_v10, %v131_v62  ;;  %v422_v46 = vld [vmem:[%s2564_s1 + $0x3a0] sm:$0xff] }
  0x2e   :  { %1353 = vmatprep.subr.mxu1 %v431_v21  ;;  %1320 = vmatprep.subr.mxu0 %v398_v24  ;;  %v113_v21 = vrot.slane %v112_v9, 2  ;;  %v125_v24 = vrot.slane %v124_v12, 4  ;;  %v406_v49 = vld [vmem:[%s2564_s1 + $0x320] sm:$0xff]  ;;  %v389_v50 = vld [vmem:[%s2564_s1 + $0x298] sm:$0xff]  ;;  %v388_v62 = vld [vmem:[%s2564_s1 + $0x290] sm:$0xff] }
  0x2f   :  { %1354 = vmatpush3.msra.mxu1 %v415_v23  ;;  %1321 = vmatpush3.msra.mxu0 %v382_v26  ;;  %v245_v23 = vadd.f32 %v244_v11, %v243_v63  ;;  %v376_v26 = vld [vmem:[%s2564_s1 + $0x230] sm:$0xff]  ;;  %v421_v55 = vld [vmem:[%s2564_s1 + $0x398] sm:$0xff]  ;;  %v387_v4 = vld [vmem:[%s2564_s1 + $0x288] sm:$0xff] }
  0x30   :  { %1355 = vmatprep.subr.mxu1 %v430_v25  ;;  %1322 = vmatprep.subr.mxu0 %v397_v28  ;;  %v424_v25 = vld [vmem:[%s2564_s1 + $0x3b0] sm:$0xff]  ;;  %v233_v28 = vadd.f32 %v232_v16, %v231_v2  ;;  %v373_v56 = vld [vmem:[%s2564_s1 + $0x218] sm:$0xff]  ;;  %v370_v16 = vld [vmem:[%s2564_s1 + $0x200] sm:$0xff] }
  0x31   :  { %1356 = vmatpush3.msra.mxu1 %v414_v27  ;;  %1323 = vmatpush3.msra.mxu0 %v381_v30  ;;  %v121_v27 = vadd.f32 %v120_v15, %v119_v1  ;;  %v237_v30 = vrot.slane %v236_v18, 4  ;;  %v246_v35 = vrot.slane %v245_v23, 2  ;;  %v405_v61 = vld [vmem:[%s2564_s1 + $0x318] sm:$0xff]  ;;  %v420_v63 = vld [vmem:[%s2564_s1 + $0x390] sm:$0xff]  ;;  %v418_v15 = vld [vmem:[%s2564_s1 + $0x380] sm:$0xff] }
  0x32   :  { %1357 = vmatprep.subr.mxu1 %v429_v29  ;;  %1324 = vmatprep.subr.mxu0 %v396_v32  ;;  %v225_v29 = vrot.slane %v224_v17, 2  ;;  %v391_v32 = vld [vmem:[%s2564_s1 + $0x2a8] sm:$0xff]  ;;  %v234_v52 = vrot.slane %v233_v28, 1  ;;  %v372_v0 = vld [vmem:[%s2564_s1 + $0x210] sm:$0xff] }
  0x33   :  { %1358 = vmatpush3.msra.mxu1 %v413_v31  ;;  %1325 = vmatpush3.msra.mxu0 %v380_v34  ;;  %v408_v31 = vld [vmem:[%s2564_s1 + $0x330] sm:$0xff]  ;;  %v134_v34 = vrot.slane %v133_v22, 2  ;;  %v238_v40 = vadd.f32 %v237_v30, %v236_v18  ;;  %v247_v44 = vadd.f32 %v246_v35, %v245_v23  ;;  %v122_v51 = vrot.slane %v121_v27, 1  ;;  %v465_v23 = vld [vmem:[%s2564_s1 + $0x4f8] sm:$0xff]  ;;  %v495_v35 = vld [vmem:[%s2564_s1 + $0x5e8] sm:$0xff] }
  0x34   :  { %1359 = vmatprep.subr.mxu1 %v428_v33  ;;  %1326 = vmatprep.subr.mxu0 %v395_v37  ;;  %v114_v33 = vadd.f32 %v113_v21, %v112_v9  ;;  %v423_v37 = vld [vmem:[%s2564_s1 + $0x3a8] sm:$0xff]  ;;  %v226_v39 = vadd.f32 %v225_v29, %v224_v17  ;;  %v404_v3 = vld [vmem:[%s2564_s1 + $0x310] sm:$0xff]  ;;  %v235_v6 = vadd.f32 %v234_v52, %v233_v28 }
  0x35   :  { %1360 = vmatpush3.msra.mxu1 %v412_v36  ;;  %1327 = vmatpush3.msra.mxu0 %v379_v42  ;;  %v126_v36 = vadd.f32 %v125_v24, %v124_v12  ;;  %v390_v42 = vld [vmem:[%s2564_s1 + $0x2a0] sm:$0xff]  ;;  %v135_v43 = vadd.f32 %v134_v34, %v133_v22  ;;  %v123_v5 = vadd.f32 %v122_v51, %v121_v27  ;;  %v371_v9 = vld [vmem:[%s2564_s1 + $0x208] sm:$0xff]  ;;  %v497_v24 = vld [vmem:[%s2564_s1 + $0x5f8] sm:$0xff] }
  0x36   :  { %1361 = vmatprep.subr.mxu1 %v427_v41  ;;  %1328 = vmatprep.subr.mxu0 %v394_v48  ;;  %v407_v41 = vld [vmem:[%s2564_s1 + $0x328] sm:$0xff]  ;;  %v239_v48 = vrot.slane %v238_v40, 2  ;;  %v115_v53 = vrot.slane %v114_v33, 1  ;;  %v227_v57 = vrot.slane %v226_v39, 1  ;;  %v464_v28 = vld [vmem:[%s2564_s1 + $0x4f0] sm:$0xff]  ;;  %v446_v51 = vld [vmem:[%s2564_s1 + $0x460] sm:$0xff] }
  0x37   :  { %1362 = vmatpush3.msra.mxu1 %v411_v47  ;;  %1329 = vmatpush3.msra.mxu0 %v378_v60  ;;  %v127_v45 = vrot.slane %v126_v36, 2  ;;  %v374_v47 = vld [vmem:[%s2564_s1 + $0x220] sm:$0xff]  ;;  %v136_v58 = vrot.slane %v135_v43, 1  ;;  %v496_v29 = vld [vmem:[%s2564_s1 + $0x5f0] sm:$0xff]  ;;  %v43_v34 = vld [vmem:[%s2563_s0 + $0xc8] sm:$0xff] }
  0x38   :  { %1363 = vmatprep.subr.mxu1 %v426_v59  ;;  %1330 = vmatprep.subr.mxu0 %v393_v8  ;;  %v248_v59 = vrot.slane %v247_v44, 1  ;;  %v240_v60 = vadd.f32 %v239_v48, %v238_v40  ;;  %v419_v8 = vld [vmem:[%s2564_s1 + $0x388] sm:$0xff]  ;;  %v228_v10 = vadd.f32 %v227_v57, %v226_v39  ;;  %v448_v30 = vld [vmem:[%s2564_s1 + $0x470] sm:$0xff]  ;;  %v462_v40 = vld [vmem:[%s2564_s1 + $0x4e0] sm:$0xff] }
  0x39   :  { %1364 = vmatpush3.msra.mxu1 %v410_v7  ;;  %1331 = vmatpush3.msra.mxu0 %v377_v14  ;;  %v128_v54 = vadd.f32 %v127_v45, %v126_v36  ;;  %v116_v7 = vadd.f32 %v115_v53, %v114_v33  ;;  %v137_v11 = vadd.f32 %v136_v58, %v135_v43  ;;  %v386_v14 = vld [vmem:[%s2564_s1 + $0x280] sm:$0xff]  ;;  %v27_v33 = vld [vmem:[%s2563_s0 + $0x48] sm:$0xff]  ;;  %v61_v53 = vld [vmem:[%s2563_s0 + $0x158] sm:$0xff] }
  0x3a   :  { %1365 = vmatprep.subr.mxu1 %v425_v13  ;;  %1332 = vmatprep.subr.mxu0 %v392_v20  ;;  %v241_v2 = vrot.slane %v240_v60, 1  ;;  %v249_v12 = vadd.f32 %v248_v59, %v247_v44  ;;  %v403_v13 = vld [vmem:[%s2564_s1 + $0x308] sm:$0xff]  ;;  %v402_v20 = vld [vmem:[%s2564_s1 + $0x300] sm:$0xff]  ;;  %v28_v58 = vld [vmem:[%s2563_s0 + $0x50] sm:$0xff] }
  0x3b   :  { %1366 = vmatpush3.msra.mxu1 %v409_v19  ;;  %1333 = vmatpush3.msra.mxu0 %v376_v26  ;;  %v129_v1 = vrot.slane %v128_v54, 1  ;;  %v600_v19 = vsel %vm594_vm0, %v235_v6, %v123_v5  ;;  %v599_v21 = vsel %vm594_vm0, %v228_v10, %v116_v7  ;;  %v481_v26 = vld [vmem:[%s2564_s1 + $0x578] sm:$0xff]  ;;  %v447_v36 = vld [vmem:[%s2564_s1 + $0x468] sm:$0xff]  ;;  %v26_v43 = vld [vmem:[%s2563_s0 + $0x40] sm:$0xff] }
  0x3c   :  { %1367 = vmatprep.subr.mxu1 %v424_v25  ;;  %1334 = vmatprep.subr.mxu0 %v391_v32  ;;  %v242_v18 = vadd.f32 %v241_v2, %v240_v60  ;;  %v602_v22 = vsel %vm594_vm0, %v249_v12, %v137_v11  ;;  %v449_v25 = vld [vmem:[%s2564_s1 + $0x478] sm:$0xff]  ;;  %v463_v32 = vld [vmem:[%s2564_s1 + $0x4e8] sm:$0xff]  ;;  %v42_v44 = vld [vmem:[%s2563_s0 + $0xc0] sm:$0xff] }
  0x3d   :  { %1368 = vmatpush3.msra.mxu1 %v408_v31  ;;  %1335 = vmatpush3.msra.mxu0 %v375_v38  ;;  %v130_v17 = vadd.f32 %v129_v1, %v128_v54  ;;  %v480_v31 = vld [vmem:[%s2564_s1 + $0x570] sm:$0xff]  ;;  %v75_v38 = vld [vmem:[%s2563_s0 + $0x1c8] sm:$0xff]  ;;  %v58_v45 = vld [vmem:[%s2563_s0 + $0x140] sm:$0xff]  ;;  %v138_v48 = vadd.f32 %v42_v44, %v26_v43 }
  0x3e   :  { %1369 = vmatprep.subr.mxu1 %v423_v37  ;;  %1336 = vmatprep.subr.mxu0 %v390_v42  ;;  %v59_v37 = vld [vmem:[%s2563_s0 + $0x148] sm:$0xff]  ;;  %v77_v54 = vld [vmem:[%s2563_s0 + $0x1d8] sm:$0xff]  ;;  %v44_v59 = vld [vmem:[%s2563_s0 + $0xd0] sm:$0xff] }
  0x3f   :  { %1370 = vmatpush3.msra.mxu1 %v407_v41  ;;  %1337 = vmatpush3.msra.mxu0 %v374_v47  ;;  %v601_v27 = vsel %vm594_vm0, %v242_v18, %v130_v17  ;;  %v479_v39 = vld [vmem:[%s2564_s1 + $0x568] sm:$0xff]  ;;  %v145_v41 = vadd.f32 %v43_v34, %v27_v33  ;;  %v257_v42 = vadd.f32 %v75_v38, %v59_v37  ;;  %v74_v47 = vld [vmem:[%s2563_s0 + $0x1c0] sm:$0xff]  ;;  %v461_v60 = vld [vmem:[%s2564_s1 + $0x4d8] sm:$0xff] }
  0x40   :  { %1371 = vmatprep.subr.mxu1 %v422_v46  ;;  %1338 = vmatprep.subr.mxu0 %v389_v50  ;;  %v494_v46 = vld [vmem:[%s2564_s1 + $0x5e0] sm:$0xff]  ;;  %v45_v50 = vld [vmem:[%s2563_s0 + $0xd8] sm:$0xff]  ;;  %v250_v52 = vadd.f32 %v74_v47, %v58_v45  ;;  %v271_v57 = vadd.f32 %v77_v54, %v61_v53  ;;  %v76_v1 = vld [vmem:[%s2563_s0 + $0x1d0] sm:$0xff]  ;;  %v152_v2 = vadd.f32 %v44_v59, %v28_v58 }
  0x41   :  { %1372 = vmatpush3.msra.mxu1 %v406_v49  ;;  %1339 = vmatpush3.msra.mxu0 %v373_v56  ;;  %v29_v49 = vld [vmem:[%s2563_s0 + $0x58] sm:$0xff]  ;;  %v478_v56 = vld [vmem:[%s2564_s1 + $0x560] sm:$0xff]  ;;  %v460_v10 = vld [vmem:[%s2564_s1 + $0x4d0] sm:$0xff] }
  0x42   :  { %1373 = vmatprep.subr.mxu1 %v421_v55  ;;  %1340 = vmatprep.subr.mxu0 %v388_v62  ;;  %v159_v55 = vadd.f32 %v45_v50, %v29_v49  ;;  %v258_v62 = vrot.slane %v257_v42, 4  ;;  %v251_v5 = vrot.slane %v250_v52, 4  ;;  %v272_v7 = vrot.slane %v271_v57, 4  ;;  %v492_v11 = vld [vmem:[%s2564_s1 + $0x5d0] sm:$0xff]  ;;  %v441_v37 = vld [vmem:[%s2564_s1 + $0x438] sm:$0xff]  ;;  %v439_v53 = vld [vmem:[%s2564_s1 + $0x428] sm:$0xff] }
  0x43   :  { %1374 = vmatpush3.msra.mxu1 %v405_v61  ;;  %1341 = vmatpush3.msra.mxu0 %v372_v0  ;;  %v146_v61 = vrot.slane %v145_v41, 4  ;;  %v60_v0 = vld [vmem:[%s2563_s0 + $0x150] sm:$0xff]  ;;  %v454_v58 = vld [vmem:[%s2564_s1 + $0x4a0] sm:$0xff] }
  0x44   :  { %1375 = vmatprep.subr.mxu1 %v420_v63  ;;  %1342 = vmatprep.subr.mxu0 %v387_v4  ;;  %v139_v63 = vrot.slane %v138_v48, 4  ;;  %v445_v4 = vld [vmem:[%s2564_s1 + $0x458] sm:$0xff]  ;;  %v160_v6 = vrot.slane %v159_v55, 4  ;;  %v444_v12 = vld [vmem:[%s2564_s1 + $0x450] sm:$0xff]  ;;  %v259_v18 = vadd.f32 %v258_v62, %v257_v42  ;;  %v486_v59 = vld [vmem:[%s2564_s1 + $0x5a0] sm:$0xff] }
  0x45   :  { %1376 = vmatpush3.msra.mxu1 %v404_v3  ;;  %1343 = vmatpush3.msra.mxu0 %v371_v9  ;;  %v493_v3 = vld [vmem:[%s2564_s1 + $0x5d8] sm:$0xff]  ;;  %v147_v17 = vadd.f32 %v146_v61, %v145_v41  ;;  %v456_v42 = vld [vmem:[%s2564_s1 + $0x4b0] sm:$0xff] }
  0x46   :  { %1377 = vmatprep.subr.mxu1 %v419_v8  ;;  %1344 = vmatprep.subr.mxu0 %v386_v14  ;;  %v264_v8 = vadd.f32 %v76_v1, %v60_v0  ;;  %v477_v9 = vld [vmem:[%s2564_s1 + $0x558] sm:$0xff]  ;;  %v260_v34 = vrot.slane %v259_v18, 2  ;;  %v488_v43 = vld [vmem:[%s2564_s1 + $0x5b0] sm:$0xff] }
  0x47   :  { %1378 = vmatpush3.msra.mxu1 %v403_v13  ;;  %1345 = vmatpush3.msra.mxu0 %v370_v16  ;;  %v153_v13 = vrot.slane %v152_v2, 4  ;;  %v459_v16 = vld [vmem:[%s2564_s1 + $0x4c8] sm:$0xff]  ;;  %v148_v33 = vrot.slane %v147_v17, 2  ;;  %v473_v41 = vld [vmem:[%s2564_s1 + $0x538] sm:$0xff]  ;;  %v440_v44 = vld [vmem:[%s2564_s1 + $0x430] sm:$0xff] }
  0x48   :  { %1379 = vmatprep.subr.mxu1 %v418_v15  ;;  %831 = vmatprep.mubr.f32.mxu0 %v600_v19  ;;  %v265_v14 = vrot.slane %v264_v8, 4  ;;  %v476_v15 = vld [vmem:[%s2564_s1 + $0x550] sm:$0xff]  ;;  %v140_v19 = vadd.f32 %v139_v63, %v138_v48  ;;  %v455_v48 = vld [vmem:[%s2564_s1 + $0x4a8] sm:$0xff]  ;;  %v261_v50 = vadd.f32 %v260_v34, %v259_v18  ;;  %v470_v63 = vld [vmem:[%s2564_s1 + $0x520] sm:$0xff] }
  0x49   :  { %1380 = vmatpush3.msra.mxu1 %v402_v20  ;;  %832 = vmatmul.mubr.f32.vlgmr.msra.gmra.mxu0 %v599_v21  ;;  %v491_v20 = vld [vmem:[%s2564_s1 + $0x5c8] sm:$0xff]  ;;  %v472_v47 = vld [vmem:[%s2564_s1 + $0x530] sm:$0xff]  ;;  %v149_v49 = vadd.f32 %v148_v33, %v147_v17  ;;  %v453_v0 = vld [vmem:[%s2564_s1 + $0x498] sm:$0xff] }
  0x4a   :  { %901 = vmatprep.mubr.f32.mxu1 %v602_v22  ;;  %1384 = vmatprep.subr.mxu0 %v465_v23  ;;  %v443_v21 = vld [vmem:[%s2564_s1 + $0x448] sm:$0xff]  ;;  %v252_v22 = vadd.f32 %v251_v5, %v250_v52  ;;  %v161_v23 = vadd.f32 %v160_v6, %v159_v55  ;;  %v437_v5 = vld [vmem:[%s2564_s1 + $0x418] sm:$0xff] }
  0x4b   :  { %1419 = vmatprep.subr.mxu1 %v497_v24  ;;  %902 = vmatmul.mubr.f32.vlgmr.msra.gmra.mxu1 %v601_v27  ;;  %v273_v24 = vadd.f32 %v272_v7, %v271_v57  ;;  %v490_v27 = vld [vmem:[%s2564_s1 + $0x5c0] sm:$0xff]  ;;  %v487_v52 = vld [vmem:[%s2564_s1 + $0x5a8] sm:$0xff]  ;;  %v150_v1 = vrot.slane %v149_v49, 1  ;;  %v529_v33 = vld [vmem:[%s2564_s1 + $0x6f8] sm:$0xff] }
  0x4c   :  { %1385 = vmatpush3.msra.mxu0 %v449_v25  ;;  %1420 = vmatpush3.msra.mxu1 %v481_v26  ;;  %v475_v25 = vld [vmem:[%s2564_s1 + $0x548] sm:$0xff]  ;;  %v458_v26 = vld [vmem:[%s2564_s1 + $0x4c0] sm:$0xff]  ;;  %v253_v38 = vrot.slane %v252_v22, 2  ;;  %v561_v34 = vld [vmem:[%s2564_s1 + $0x7f8] sm:$0xff] }
  0x4d   :  { %1386 = vmatprep.subr.mxu0 %v464_v28  ;;  %1421 = vmatprep.subr.mxu1 %v496_v29  ;;  %v442_v28 = vld [vmem:[%s2564_s1 + $0x440] sm:$0xff]  ;;  %v154_v29 = vadd.f32 %v153_v13, %v152_v2  ;;  %v471_v57 = vld [vmem:[%s2564_s1 + $0x528] sm:$0xff]  ;;  %v262_v2 = vrot.slane %v261_v50, 1  ;;  %v151_v17 = vadd.f32 %v150_v1, %v149_v49 }
  0x4e   :  { %1387 = vmatpush3.msra.mxu0 %v448_v30  ;;  %1422 = vmatpush3.msra.mxu1 %v480_v31  ;;  %v266_v30 = vadd.f32 %v265_v14, %v264_v8  ;;  %v474_v31 = vld [vmem:[%s2564_s1 + $0x540] sm:$0xff]  ;;  %v254_v54 = vadd.f32 %v253_v38, %v252_v22  ;;  %v31_v38 = vld [vmem:[%s2563_s0 + $0x68] sm:$0xff] }
  0x4f   :  { %1388 = vmatprep.subr.mxu0 %v463_v32  ;;  %1423 = vmatprep.subr.mxu1 %v495_v35  ;;  %v457_v32 = vld [vmem:[%s2564_s1 + $0x4b8] sm:$0xff]  ;;  %v141_v35 = vrot.slane %v140_v19, 2  ;;  %v155_v45 = vrot.slane %v154_v29, 2  ;;  %v263_v18 = vadd.f32 %v262_v2, %v261_v50 }
  0x50   :  { %1389 = vmatpush3.msra.mxu0 %v447_v36  ;;  %1424 = vmatpush3.msra.mxu1 %v479_v39  ;;  %v489_v36 = vld [vmem:[%s2564_s1 + $0x5b8] sm:$0xff]  ;;  %v162_v39 = vrot.slane %v161_v23, 2  ;;  %v255_v6 = vrot.slane %v254_v54, 1 }
  0x51   :  { %1390 = vmatprep.subr.mxu0 %v462_v40  ;;  %1425 = vmatprep.subr.mxu1 %v494_v46  ;;  %v274_v40 = vrot.slane %v273_v24, 2  ;;  %v267_v46 = vrot.slane %v266_v30, 2  ;;  %v156_v61 = vadd.f32 %v155_v45, %v154_v29  ;;  %v49_v45 = vld [vmem:[%s2563_s0 + $0xf8] sm:$0xff] }
  0x52   :  { %1391 = vmatpush3.msra.mxu0 %v446_v51  ;;  %1426 = vmatpush3.msra.mxu1 %v478_v56  ;;  %v142_v51 = vadd.f32 %v141_v35, %v140_v19  ;;  %v163_v55 = vadd.f32 %v162_v39, %v161_v23  ;;  %v256_v22 = vadd.f32 %v255_v6, %v254_v54  ;;  %v47_v39 = vld [vmem:[%s2563_s0 + $0xe8] sm:$0xff] }
  0x53   :  { %1392 = vmatprep.subr.mxu0 %v461_v60  ;;  %1427 = vmatprep.subr.mxu1 %v493_v3  ;;  %v275_v56 = vadd.f32 %v274_v40, %v273_v24  ;;  %v438_v60 = vld [vmem:[%s2564_s1 + $0x420] sm:$0xff]  ;;  %v268_v62 = vadd.f32 %v267_v46, %v266_v30  ;;  %v157_v13 = vrot.slane %v156_v61, 1  ;;  %v63_v40 = vld [vmem:[%s2563_s0 + $0x168] sm:$0xff]  ;;  %v65_v46 = vld [vmem:[%s2563_s0 + $0x178] sm:$0xff] }
  0x54   :  { %1393 = vmatpush3.msra.mxu0 %v445_v4  ;;  %1428 = vmatpush3.msra.mxu1 %v477_v9  ;;  %v143_v3 = vrot.slane %v142_v51, 1  ;;  %v485_v4 = vld [vmem:[%s2564_s1 + $0x598] sm:$0xff]  ;;  %v164_v7 = vrot.slane %v163_v55, 1 }
  0x55   :  { %1394 = vmatprep.subr.mxu0 %v460_v10  ;;  %1429 = vmatprep.subr.mxu1 %v492_v11  ;;  %v276_v8 = vrot.slane %v275_v56, 1  ;;  %v469_v9 = vld [vmem:[%s2564_s1 + $0x518] sm:$0xff]  ;;  %v452_v10 = vld [vmem:[%s2564_s1 + $0x490] sm:$0xff]  ;;  %v269_v14 = vrot.slane %v268_v62, 1  ;;  %v158_v29 = vadd.f32 %v157_v13, %v156_v61 }
  0x56   :  { %1395 = vmatpush3.msra.mxu0 %v444_v12  ;;  %1430 = vmatpush3.msra.mxu1 %v476_v15  ;;  %v484_v11 = vld [vmem:[%s2564_s1 + $0x590] sm:$0xff]  ;;  %v144_v19 = vadd.f32 %v143_v3, %v142_v51  ;;  %v165_v23 = vadd.f32 %v164_v7, %v163_v55 }
  0x57   :  { %1396 = vmatprep.subr.mxu0 %v459_v16  ;;  %1431 = vmatprep.subr.mxu1 %v491_v20  ;;  %v436_v12 = vld [vmem:[%s2564_s1 + $0x410] sm:$0xff]  ;;  %v451_v16 = vld [vmem:[%s2564_s1 + $0x488] sm:$0xff]  ;;  %v277_v24 = vadd.f32 %v276_v8, %v275_v56  ;;  %v270_v30 = vadd.f32 %v269_v14, %v268_v62 }
  0x58   :  { %1397 = vmatpush3.msra.mxu0 %v443_v21  ;;  %1432 = vmatpush3.msra.mxu1 %v475_v25  ;;  %v468_v15 = vld [vmem:[%s2564_s1 + $0x510] sm:$0xff]  ;;  %v483_v20 = vld [vmem:[%s2564_s1 + $0x588] sm:$0xff]  ;;  %v603_v35 = vsel %vm594_vm0, %v256_v22, %v144_v19 }
  0x59   :  { %1398 = vmatprep.subr.mxu0 %v458_v26  ;;  %1433 = vmatprep.subr.mxu1 %v490_v27  ;;  %v435_v21 = vld [vmem:[%s2564_s1 + $0x408] sm:$0xff]  ;;  %v450_v26 = vld [vmem:[%s2564_s1 + $0x480] sm:$0xff] }
  0x5a   :  { %1399 = vmatpush3.msra.mxu0 %v442_v28  ;;  %1434 = vmatpush3.msra.mxu1 %v474_v31  ;;  %v467_v25 = vld [vmem:[%s2564_s1 + $0x508] sm:$0xff]  ;;  %v482_v27 = vld [vmem:[%s2564_s1 + $0x580] sm:$0xff]  ;;  %v604_v31 = vsel %vm594_vm0, %v263_v18, %v151_v17 }
  0x5b   :  { %1400 = vmatprep.subr.mxu0 %v457_v32  ;;  %1435 = vmatprep.subr.mxu1 %v489_v36  ;;  %v434_v28 = vld [vmem:[%s2564_s1 + $0x400] sm:$0xff]  ;;  %v606_v36 = vsel %vm594_vm0, %v277_v24, %v165_v23 }
  0x5c   :  { %1401 = vmatpush3.msra.mxu0 %v441_v37  ;;  %1436 = vmatpush3.msra.mxu1 %v473_v41  ;;  %v466_v32 = vld [vmem:[%s2564_s1 + $0x500] sm:$0xff]  ;;  %v513_v37 = vld [vmem:[%s2564_s1 + $0x678] sm:$0xff]  ;;  %v79_v41 = vld [vmem:[%s2563_s0 + $0x1e8] sm:$0xff] }
  0x5d   :  { %1402 = vmatprep.subr.mxu0 %v456_v42  ;;  %1437 = vmatprep.subr.mxu1 %v488_v43  ;;  %v33_v42 = vld [vmem:[%s2563_s0 + $0x78] sm:$0xff] }
  0x5e   :  { %1403 = vmatpush3.msra.mxu0 %v440_v44  ;;  %1438 = vmatpush3.msra.mxu1 %v472_v47  ;;  %v545_v43 = vld [vmem:[%s2564_s1 + $0x778] sm:$0xff]  ;;  %v528_v44 = vld [vmem:[%s2564_s1 + $0x6f0] sm:$0xff] }
  0x5f   :  { %1404 = vmatprep.subr.mxu0 %v455_v48  ;;  %1439 = vmatprep.subr.mxu1 %v487_v52 }
  0x60   :  { %1405 = vmatpush3.msra.mxu0 %v439_v53  ;;  %1440 = vmatpush3.msra.mxu1 %v471_v57 }
  0x61   :  { %1406 = vmatprep.subr.mxu0 %v454_v58  ;;  %1441 = vmatprep.subr.mxu1 %v486_v59 }
  0x62   :  { %1407 = vmatpush3.msra.mxu0 %v438_v60  ;;  %1442 = vmatpush3.msra.mxu1 %v470_v63 }
  0x63   :  { %1408 = vmatprep.subr.mxu0 %v453_v0  ;;  %1443 = vmatprep.subr.mxu1 %v485_v4 }
  0x64   :  { %1409 = vmatpush3.msra.mxu0 %v437_v5  ;;  %1444 = vmatpush3.msra.mxu1 %v469_v9 }
  0x65   :  { %1410 = vmatprep.subr.mxu0 %v452_v10  ;;  %1445 = vmatprep.subr.mxu1 %v484_v11 }
  0x66   :  { %1411 = vmatpush3.msra.mxu0 %v436_v12  ;;  %1446 = vmatpush3.msra.mxu1 %v468_v15 }
  0x67   :  { %1412 = vmatprep.subr.mxu0 %v451_v16  ;;  %1447 = vmatprep.subr.mxu1 %v483_v20 }
  0x68   :  { %1413 = vmatpush3.msra.mxu0 %v435_v21  ;;  %1448 = vmatpush3.msra.mxu1 %v467_v25 }
  0x69   :  { %1414 = vmatprep.subr.mxu0 %v450_v26  ;;  %1449 = vmatprep.subr.mxu1 %v482_v27 }
  0x6a   :  { %1415 = vmatpush3.msra.mxu0 %v434_v28 }
  0x6b   :  { %9 = vsyncpa [#allocation3], 0  ;;  %971 = vmatprep.mubr.f32.mxu0 %v604_v31  ;;  %1450 = vmatpush3.msra.mxu1 %v466_v32  ;;  %v605_v47 = vsel %vm594_vm0, %v270_v30, %v158_v29  ;;  %v560_v48 = vld [vmem:[%s2564_s1 + $0x7f0] sm:$0xff]  ;;  %v81_v50 = vld [vmem:[%s2563_s0 + $0x1f8] sm:$0xff]  ;;  %v173_v61 = vadd.f32 %v47_v39, %v31_v38  ;;  %v285_v62 = vadd.f32 %v79_v41, %v63_v40  ;;  %vm1188_vm1 = vcmask 254976   ;;  %s1549_s29 = smov [#allocation2]  }
  0x6c   :  { %v512_v49 = vld [vmem:[%s2564_s1 + $0x670] sm:$0xff]  ;;  %v30_v51 = vld [vmem:[%s2563_s0 + $0x60] sm:$0xff]  ;;  %972 = vmatmul.mubr.f32.vlgmr.msra.gmra.mxu0 %v603_v35  ;;  %1041 = vmatprep.mubr.f32.mxu1 %v606_v36  ;;  %v527_v60 = vld [vmem:[%s2564_s1 + $0x6e8] sm:$0xff]  ;;  %v187_v63 = vadd.f32 %v49_v45, %v33_v42  ;;  %v299_v2 = vadd.f32 %v81_v50, %v65_v46  ;;  %s1236_s30 = sshll.u32 %s1549_s29, 4  ;;  %s1237_s30 = int_to_ptr.vmem [resolvable:$true] %s1236_s30 }
  0x6d   :  { %v46_v52 = vld [vmem:[%s2563_s0 + $0xe0] sm:$0xff]  ;;  %v32_v55 = vld [vmem:[%s2563_s0 + $0x70] sm:$0xff]  ;;  %1454 = vmatprep.subr.mxu0 %v529_v33  ;;  %1489 = vmatprep.subr.mxu1 %v561_v34  ;;  %v559_v0 = vld [vmem:[%s2564_s1 + $0x7e8] sm:$0xff]  ;;  %v174_v13 = vrot.slane %v173_v61, 4  ;;  %v286_v14 = vrot.slane %v285_v62, 4  ;;  %s1527_s5 = scalar_lea.vmem %s1237_s30, 32  ;;  %p1532_p1 = scmp.lt.s32.totalorder %s1237_s30, %s1237_s30 }
  0x6e   :  { %v62_v53 = vld [vmem:[%s2563_s0 + $0x160] sm:$0xff]  ;;  %v48_v56 = vld [vmem:[%s2563_s0 + $0xf0] sm:$0xff]  ;;  %1042 = vmatmul.mubr.f32.vlgmr.msra.gmra.mxu1 %v605_v47  ;;  %1455 = vmatpush3.msra.mxu0 %v513_v37  ;;  %v511_v1 = vld [vmem:[%s2564_s1 + $0x668] sm:$0xff]  ;;  %v166_v3 = vadd.f32 %v46_v52, %v30_v51  ;;  %v188_v15 = vrot.slane %v187_v63, 4  ;;  %v300_v18 = vrot.slane %v299_v2, 4  ;;  %p1528_p0 = scmp.ne.s32.totalorder %s1237_s30, %s1527_s5  ;;  %p1533_p2 = scmp.lt.s32.totalorder %s1527_s5, %s1527_s5 }
  0x6f   :  { %v78_v54 = vld [vmem:[%s2563_s0 + $0x1e0] sm:$0xff]  ;;  %v64_v57 = vld [vmem:[%s2563_s0 + $0x170] sm:$0xff]  ;;  %1490 = vmatpush3.msra.mxu1 %v545_v43  ;;  %1456 = vmatprep.subr.mxu0 %v528_v44  ;;  %v543_v5 = vld [vmem:[%s2564_s1 + $0x768] sm:$0xff]  ;;  %v180_v7 = vadd.f32 %v48_v56, %v32_v55  ;;  %v175_v29 = vadd.f32 %v174_v13, %v173_v61  ;;  %v287_v30 = vadd.f32 %v286_v14, %v285_v62 }
  0x70   :  { %v80_v58 = vld [vmem:[%s2563_s0 + $0x1f0] sm:$0xff]  ;;  %v278_v4 = vadd.f32 %v78_v54, %v62_v53  ;;  %1491 = vmatprep.subr.mxu1 %v560_v48  ;;  %1457 = vmatpush3.msra.mxu0 %v512_v49  ;;  %v526_v6 = vld [vmem:[%s2564_s1 + $0x6e0] sm:$0xff]  ;;  %v525_v12 = vld [vmem:[%s2564_s1 + $0x6d8] sm:$0xff]  ;;  %v167_v19 = vrot.slane %v166_v3, 4  ;;  %v189_v31 = vadd.f32 %v188_v15, %v187_v63  ;;  %v301_v34 = vadd.f32 %v300_v18, %v299_v2  ;;  %p1534_p3 = por %p1533_p2, %p1532_p1 }
  0x71   :  { %v544_v59 = vld [vmem:[%s2564_s1 + $0x770] sm:$0xff]  ;;  %v292_v8 = vadd.f32 %v80_v58, %v64_v57  ;;  %1458 = vmatprep.subr.mxu0 %v527_v60  ;;  %v558_v9 = vld [vmem:[%s2564_s1 + $0x7e0] sm:$0xff]  ;;  %v557_v16 = vld [vmem:[%s2564_s1 + $0x7d8] sm:$0xff]  ;;  %v181_v23 = vrot.slane %v180_v7, 4  ;;  %v176_v45 = vrot.slane %v175_v29, 2  ;;  %v288_v46 = vrot.slane %v287_v30, 2 }
  0x72   :  { %1492 = vmatpush3.msra.mxu1 %v544_v59  ;;  %v510_v10 = vld [vmem:[%s2564_s1 + $0x660] sm:$0xff]  ;;  %1459 = vmatpush3.msra.mxu0 %v511_v1  ;;  %v509_v17 = vld [vmem:[%s2564_s1 + $0x658] sm:$0xff]  ;;  %v279_v20 = vrot.slane %v278_v4, 4  ;;  %v524_v22 = vld [vmem:[%s2564_s1 + $0x6d0] sm:$0xff]  ;;  %v168_v35 = vadd.f32 %v167_v19, %v166_v3  ;;  %v190_v47 = vrot.slane %v189_v31, 2  ;;  %v302_v50 = vrot.slane %v301_v34, 2  ;;  %p1535_p4 = pnand %p1534_p3, %p1528_p0 }
  0x73   :  { %1493 = vmatprep.subr.mxu1 %v559_v0  ;;  %v542_v11 = vld [vmem:[%s2564_s1 + $0x760] sm:$0xff]  ;;  %1460 = vmatprep.subr.mxu0 %v526_v6  ;;  %v541_v21 = vld [vmem:[%s2564_s1 + $0x758] sm:$0xff]  ;;  %v293_v24 = vrot.slane %v292_v8, 4  ;;  %v556_v25 = vld [vmem:[%s2564_s1 + $0x7d0] sm:$0xff]  ;;  %v182_v39 = vadd.f32 %v181_v23, %v180_v7  ;;  %v177_v61 = vadd.f32 %v176_v45, %v175_v29  ;;  %v289_v62 = vadd.f32 %v288_v46, %v287_v30 }
  0x74   :  { %1494 = vmatpush3.msra.mxu1 %v543_v5  ;;  %1461 = vmatpush3.msra.mxu0 %v510_v10  ;;  %v508_v26 = vld [vmem:[%s2564_s1 + $0x650] sm:$0xff]  ;;  %v523_v28 = vld [vmem:[%s2564_s1 + $0x6c8] sm:$0xff]  ;;  %v280_v36 = vadd.f32 %v279_v20, %v278_v4  ;;  %v522_v38 = vld [vmem:[%s2564_s1 + $0x6c0] sm:$0xff]  ;;  %v169_v51 = vrot.slane %v168_v35, 2  ;;  %v191_v63 = vadd.f32 %v190_v47, %v189_v31  ;;  %v303_v2 = vadd.f32 %v302_v50, %v301_v34 }
  0x75   :  { %1495 = vmatprep.subr.mxu1 %v558_v9  ;;  %1462 = vmatprep.subr.mxu0 %v525_v12  ;;  %v540_v27 = vld [vmem:[%s2564_s1 + $0x750] sm:$0xff]  ;;  %v555_v32 = vld [vmem:[%s2564_s1 + $0x7c8] sm:$0xff]  ;;  %v294_v40 = vadd.f32 %v293_v24, %v292_v8  ;;  %v554_v41 = vld [vmem:[%s2564_s1 + $0x7c0] sm:$0xff]  ;;  %v183_v55 = vrot.slane %v182_v39, 2  ;;  %v178_v13 = vrot.slane %v177_v61, 1  ;;  %v290_v14 = vrot.slane %v289_v62, 1 }
  0x76   :  { %1496 = vmatpush3.msra.mxu1 %v542_v11  ;;  %1463 = vmatpush3.msra.mxu0 %v509_v17  ;;  %v507_v33 = vld [vmem:[%s2564_s1 + $0x648] sm:$0xff]  ;;  %v506_v42 = vld [vmem:[%s2564_s1 + $0x640] sm:$0xff]  ;;  %v521_v44 = vld [vmem:[%s2564_s1 + $0x6b8] sm:$0xff]  ;;  %v281_v52 = vrot.slane %v280_v36, 2  ;;  %v170_v3 = vadd.f32 %v169_v51, %v168_v35  ;;  %v192_v15 = vrot.slane %v191_v63, 1  ;;  %v304_v18 = vrot.slane %v303_v2, 1 }
  0x77   :  { %1497 = vmatprep.subr.mxu1 %v557_v16  ;;  %1464 = vmatprep.subr.mxu0 %v524_v22  ;;  %v539_v37 = vld [vmem:[%s2564_s1 + $0x748] sm:$0xff]  ;;  %v538_v43 = vld [vmem:[%s2564_s1 + $0x740] sm:$0xff]  ;;  %v553_v48 = vld [vmem:[%s2564_s1 + $0x7b8] sm:$0xff]  ;;  %v295_v56 = vrot.slane %v294_v40, 2  ;;  %v184_v7 = vadd.f32 %v183_v55, %v182_v39  ;;  %v179_v29 = vadd.f32 %v178_v13, %v177_v61  ;;  %v291_v30 = vadd.f32 %v290_v14, %v289_v62 }
  0x78   :  { %1498 = vmatpush3.msra.mxu1 %v541_v21  ;;  %1465 = vmatpush3.msra.mxu0 %v508_v26  ;;  %v505_v49 = vld [vmem:[%s2564_s1 + $0x638] sm:$0xff]  ;;  %v520_v54 = vld [vmem:[%s2564_s1 + $0x6b0] sm:$0xff]  ;;  %v519_v60 = vld [vmem:[%s2564_s1 + $0x6a8] sm:$0xff]  ;;  %v282_v4 = vadd.f32 %v281_v52, %v280_v36  ;;  %v171_v19 = vrot.slane %v170_v3, 1  ;;  %v193_v31 = vadd.f32 %v192_v15, %v191_v63  ;;  %v305_v34 = vadd.f32 %v304_v18, %v303_v2 }
  0x79   :  { %1499 = vmatprep.subr.mxu1 %v556_v25  ;;  %1466 = vmatprep.subr.mxu0 %v523_v28  ;;  %v537_v53 = vld [vmem:[%s2564_s1 + $0x738] sm:$0xff]  ;;  %v552_v57 = vld [vmem:[%s2564_s1 + $0x7b0] sm:$0xff]  ;;  %v551_v0 = vld [vmem:[%s2564_s1 + $0x7a8] sm:$0xff]  ;;  %v296_v8 = vadd.f32 %v295_v56, %v294_v40  ;;  %v185_v23 = vrot.slane %v184_v7, 1 }
  0x7a   :  { %1500 = vmatpush3.msra.mxu1 %v540_v27  ;;  %1467 = vmatpush3.msra.mxu0 %v507_v33  ;;  %v504_v58 = vld [vmem:[%s2564_s1 + $0x630] sm:$0xff]  ;;  %v503_v1 = vld [vmem:[%s2564_s1 + $0x628] sm:$0xff]  ;;  %v518_v6 = vld [vmem:[%s2564_s1 + $0x6a0] sm:$0xff]  ;;  %v283_v20 = vrot.slane %v282_v4, 1  ;;  %v172_v35 = vadd.f32 %v171_v19, %v170_v3  ;;  %v610_v45 = vsel %vm594_vm0, %v305_v34, %v193_v31 }
  0x7b   :  { %1501 = vmatprep.subr.mxu1 %v555_v32  ;;  %1468 = vmatprep.subr.mxu0 %v522_v38  ;;  %v536_v59 = vld [vmem:[%s2564_s1 + $0x730] sm:$0xff]  ;;  %v535_v5 = vld [vmem:[%s2564_s1 + $0x728] sm:$0xff]  ;;  %v550_v9 = vld [vmem:[%s2564_s1 + $0x7a0] sm:$0xff]  ;;  %v297_v24 = vrot.slane %v296_v8, 1  ;;  %v186_v39 = vadd.f32 %v185_v23, %v184_v7 }
  0x7c   :  { %1502 = vmatpush3.msra.mxu1 %v539_v37  ;;  %1469 = vmatpush3.msra.mxu0 %v506_v42  ;;  %v502_v10 = vld [vmem:[%s2564_s1 + $0x620] sm:$0xff]  ;;  %v517_v12 = vld [vmem:[%s2564_s1 + $0x698] sm:$0xff]  ;;  %v516_v22 = vld [vmem:[%s2564_s1 + $0x690] sm:$0xff]  ;;  %v284_v36 = vadd.f32 %v283_v20, %v282_v4 }
  0x7d   :  { %1503 = vmatprep.subr.mxu1 %v554_v41  ;;  %1470 = vmatprep.subr.mxu0 %v521_v44  ;;  %v534_v11 = vld [vmem:[%s2564_s1 + $0x720] sm:$0xff]  ;;  %v549_v16 = vld [vmem:[%s2564_s1 + $0x798] sm:$0xff]  ;;  %v548_v25 = vld [vmem:[%s2564_s1 + $0x790] sm:$0xff]  ;;  %v298_v40 = vadd.f32 %v297_v24, %v296_v8 }
  0x7e   :  { %1504 = vmatpush3.msra.mxu1 %v538_v43  ;;  %1471 = vmatpush3.msra.mxu0 %v505_v49  ;;  %v501_v17 = vld [vmem:[%s2564_s1 + $0x618] sm:$0xff]  ;;  %v500_v26 = vld [vmem:[%s2564_s1 + $0x610] sm:$0xff]  ;;  %v515_v28 = vld [vmem:[%s2564_s1 + $0x688] sm:$0xff]  ;;  %v608_v43 = vsel %vm594_vm0, %v291_v30, %v179_v29  ;;  %v607_v46 = vsel %vm594_vm0, %v284_v36, %v172_v35  ;;  %v1216_v35 = vlaneseq }
  0x7f   :  { %1505 = vmatprep.subr.mxu1 %v553_v48  ;;  %1472 = vmatprep.subr.mxu0 %v520_v54  ;;  %v533_v21 = vld [vmem:[%s2564_s1 + $0x718] sm:$0xff]  ;;  %v532_v27 = vld [vmem:[%s2564_s1 + $0x710] sm:$0xff]  ;;  %v547_v32 = vld [vmem:[%s2564_s1 + $0x788] sm:$0xff]  ;;  %v609_v47 = vsel %vm594_vm0, %v298_v40, %v186_v39 }
  0x80   :  { %1506 = vmatpush3.msra.mxu1 %v537_v53  ;;  %1473 = vmatpush3.msra.mxu0 %v504_v58  ;;  %v499_v33 = vld [vmem:[%s2564_s1 + $0x608] sm:$0xff]  ;;  %v514_v38 = vld [vmem:[%s2564_s1 + $0x680] sm:$0xff]  ;;  %v1217_v36 = vshrl.u32 %v1216_v35, 7 }
  0x81   :  { %1507 = vmatprep.subr.mxu1 %v552_v57  ;;  %1474 = vmatprep.subr.mxu0 %v519_v60  ;;  %v531_v37 = vld [vmem:[%s2564_s1 + $0x708] sm:$0xff]  ;;  %v546_v41 = vld [vmem:[%s2564_s1 + $0x780] sm:$0xff] }
  0x82   :  { %1508 = vmatpush3.msra.mxu1 %v536_v59  ;;  %1475 = vmatpush3.msra.mxu0 %v503_v1  ;;  %v498_v42 = vld [vmem:[%s2564_s1 + $0x600] sm:$0xff] }
  0x83   :  { %1509 = vmatprep.subr.mxu1 %v551_v0  ;;  %1476 = vmatprep.subr.mxu0 %v518_v6  ;;  %v530_v44 = vld [vmem:[%s2564_s1 + $0x700] sm:$0xff] }
  0x84   :  { %1510 = vmatpush3.msra.mxu1 %v535_v5  ;;  %1477 = vmatpush3.msra.mxu0 %v502_v10 }
  0x85   :  { %1511 = vmatprep.subr.mxu1 %v550_v9  ;;  %1478 = vmatprep.subr.mxu0 %v517_v12 }
  0x86   :  { %1512 = vmatpush3.msra.mxu1 %v534_v11  ;;  %1479 = vmatpush3.msra.mxu0 %v501_v17 }
  0x87   :  { %1513 = vmatprep.subr.mxu1 %v549_v16  ;;  %1480 = vmatprep.subr.mxu0 %v516_v22 }
  0x88   :  { %1514 = vmatpush3.msra.mxu1 %v533_v21  ;;  %1481 = vmatpush3.msra.mxu0 %v500_v26 }
  0x89   :  { %1515 = vmatprep.subr.mxu1 %v548_v25  ;;  %1482 = vmatprep.subr.mxu0 %v515_v28 }
  0x8a   :  { %1516 = vmatpush3.msra.mxu1 %v532_v27  ;;  %1483 = vmatpush3.msra.mxu0 %v499_v33 }
  0x8b   :  { %1517 = vmatprep.subr.mxu1 %v547_v32  ;;  %1484 = vmatprep.subr.mxu0 %v514_v38  ;;  %v1218_v38 = vsub.s32 0, %v1217_v36 }
  0x8c   :  { %1518 = vmatpush3.msra.mxu1 %v531_v37  ;;  %1485 = vmatpush3.msra.mxu0 %v498_v42  ;;  %v1208_v37 = vld [vmem:[%s2565_s2] sm:$0x1] }
  0x8d   :  { %1519 = vmatprep.subr.mxu1 %v546_v41  ;;  %1111 = vmatprep.mubr.f32.mxu0 %v608_v43  ;;  %v1212_v41 = vld [vmem:[%s2566_s3] sm:$0x1] }
  0x8e   :  { %1520 = vmatpush3.msra.mxu1 %v530_v44  ;;  %1181 = vmatprep.mubr.f32.mxu1 %v610_v45 }
  0x8f   :  { %1112 = vmatmul.mubr.f32.vlgmr.msra.gmra.mxu0 %v607_v46  ;;  %1182 = vmatmul.mubr.f32.vlgmr.msra.gmra.mxu1 %v609_v47 }
  0xe8   :  { %v1276_v48 = vpop.f32.mrf.mxu0 }
  0xea   :  { %v1311_v49 = vpop.f32.mrf.mxu1  ;;  %v1277_v50 = vpop.f32.mrf.mxu0 }
  0xeb   :  { %v1278_v55 = vadd.f32 %v1277_v50, %v1276_v48 }
  0xec   :  { %v1312_v52 = vpop.f32.mrf.mxu1 }
  0xed   :  { %v1313_v56 = vadd.f32 %v1312_v52, %v1311_v49 }
  0xef   :  { %v764_v60 = vadd.f32 %v1313_v56, %v1278_v55 }
 0x109   :  { %v1346_v51 = vpop.f32.mrf.mxu0 }
 0x10b   :  { %v1381_v53 = vpop.f32.mrf.mxu1  ;;  %v1347_v54 = vpop.f32.mrf.mxu0 }
 0x10c   :  { %v1348_v58 = vadd.f32 %v1347_v54, %v1346_v51 }
 0x10d   :  { %v1382_v59 = vpop.f32.mrf.mxu1 }
 0x10e   :  { %v834_v63 = vadd.f32 %v1348_v58, %v764_v60  ;;  %v1383_v0 = vadd.f32 %v1382_v59, %v1381_v53 }
 0x110   :  { %v904_v3 = vadd.f32 %v1383_v0, %v834_v63 }
 0x12c   :  { %v1416_v57 = vpop.f32.mrf.mxu0 }
 0x12e   :  { %v1451_v61 = vpop.f32.mrf.mxu1  ;;  %v1417_v62 = vpop.f32.mrf.mxu0 }
 0x12f   :  { %v1418_v1 = vadd.f32 %v1417_v62, %v1416_v57 }
 0x130   :  { %v1452_v2 = vpop.f32.mrf.mxu1 }
 0x131   :  { %v974_v4 = vadd.f32 %v1418_v1, %v904_v3  ;;  %v1453_v5 = vadd.f32 %v1452_v2, %v1451_v61 }
 0x133   :  { %v1044_v9 = vadd.f32 %v1453_v5, %v974_v4 }
 0x14f   :  { %v1486_v6 = vpop.f32.mrf.mxu0  ;;  %v1521_v7 = vpop.f32.mrf.mxu1 }
 0x151   :  { %v1487_v8 = vpop.f32.mrf.mxu0  ;;  %v1522_v11 = vpop.f32.mrf.mxu1 }
 0x152   :  { %v1488_v10 = vadd.f32 %v1487_v8, %v1486_v6  ;;  %v1523_v13 = vadd.f32 %v1522_v11, %v1521_v7 }
 0x154   :  { %v1114_v12 = vadd.f32 %v1488_v10, %v1044_v9 }
 0x156   :  { %v1184_v14 = vadd.f32 %v1523_v13, %v1114_v12 }
 0x158   :  { %v1187_v15 = vmul.f32 0.0625, %v1184_v14 }
 0x15a   :  { %v1189_v16 = vsel %vm1188_vm1, %v1187_v15, 0.0 }
 0x15b   :  { %v1190_v17 = vrot.slane %v1189_v16, 4 }
 0x15d   :  { %v1191_v18 = vadd.f32 %v1190_v17, %v1189_v16 }
 0x15f   :  { %v1192_v19 = vrot.slane %v1191_v18, 2 }
 0x161   :  { %v1193_v20 = vadd.f32 %v1192_v19, %v1191_v18 }
 0x163   :  { %v1194_v21 = vrot.slane %v1193_v20, 1 }
 0x165   :  { %v1195_v22 = vadd.f32 %v1194_v21, %v1193_v20 }
 0x167   :  { %v1197_v23 = vmul.f32 0.5, %v1195_v22 }
 0x169   :  { %v1198_v24 = vsub.f32 %v1187_v15, %v1197_v23 }
 0x16b   :  { %v1199_v25 = vmul.f32 %v1198_v24, %v1198_v24 }
 0x16d   :  { %v1200_v26 = vsel %vm1188_vm1, %v1199_v25, 0.0 }
 0x16e   :  { %v1201_v27 = vrot.slane %v1200_v26, 4 }
 0x170   :  { %v1202_v28 = vadd.f32 %v1201_v27, %v1200_v26 }
 0x172   :  { %v1203_v29 = vrot.slane %v1202_v28, 2 }
 0x174   :  { %v1204_v30 = vadd.f32 %v1203_v29, %v1202_v28 }
 0x176   :  { %v1205_v31 = vrot.slane %v1204_v30, 1 }
 0x178   :  { %v1206_v32 = vadd.f32 %v1205_v31, %v1204_v30 }
 0x17a   :  { %v1207_v33 = vmul.f32 0.5, %v1206_v32 }
 0x17c   :  { %v1209_v34 = vadd.f32 1e-05, %v1207_v33 }
 0x17e   :  { %1525 = vrsqrt.f32 %v1209_v34 }
 0x18b   :  { %v1526_v39 = vpop.eup %1525 }
 0x18c   :  { %v1211_v40 = vmul.f32 %v1526_v39, %v1208_v37 }
 0x18e   :  { %v1213_v42 = vmul.f32 %v1211_v40, %v1197_v23  ;;  %v1219_v43 = vrot.slane %v1211_v40, %v1218_v38 }
 0x190   :  { %v1214_v44 = vsub.f32 %v1212_v41, %v1213_v42  ;;  %v1221_v45 = vmul.f32 %v1219_v43, %v1187_v15 }
 0x192   :  { %v1226_v46 = vrot.slane %v1214_v44, %v1218_v38 }
 0x194   :  { %v1228_v47 = vadd.f32 %v1226_v46, %v1221_v45 }
 0x196   :  { %1229 = vst.msk [vmem:[#allocation2] sm:$0x3] %vm1188_vm1, %v1228_v47 }
 0x197   :  { %1538 = shalt.err (!%p1535_p4)
}
 0x198   :  { %1239 = dma.vmem_to_hbm [thread:$0]  %s1237_s30, 32, %s2567_s4, [#allocation3]  }
 0x199   :  { %1547 = dma.done.wait [#allocation3], 32  }
 0x19a   :  { %1548 = vsyncadd [#allocation3], 4294967264 }
 0x19b   :  { %1243 = vsyncpa [#allocation3], 1 }

</bundles_post_ra>
